<compile_context>
chip_gen: v5e
topology: v5e:2x2
jax: 0.10.0
libtpu: 0.0.40
codegen_flags: <defaults>
</compile_context>

<pallas_src>
import functools

import jax
import jax.numpy as jnp
from jax.experimental import pallas as pl
from jax.experimental.pallas import tpu as pltpu


def _fusion_conv_kernel(fea_ref, sem_ref, w_ref, b_ref, o_ref, xpad_ref, patches_ref,
                        *, C, H, W):
    # fea_ref:    [1, C,  H*W]           (VMEM)
    # sem_ref:    [1, 3,  H*W]           (VMEM)
    # w_ref:      [COUT_PAD, 9*CIN_PAD]  (VMEM, im2col-ordered weights)
    # b_ref:      [COUT_PAD, 1]          (VMEM)
    # o_ref:      [1, COUT_PAD, H*W]     (VMEM, lane-dense output)
    # xpad_ref:   [CIN_PAD, H*W + 2*(W+1)]  scratch: width-flattened, zero-margined input
    # patches_ref:[9*CIN_PAD, H*W]          scratch: im2col patch matrix
    HW = H * W
    CIN = C + 3
    CIN_PAD = xpad_ref.shape[0]
    MARGIN = W + 1  # flat halo: one padded row (W) + one padded column (1)

    # ---- fused concat + zero-pad into the flat buffer (replaces wrapper concat/pad) ----
    xpad_ref[...] = jnp.zeros_like(xpad_ref)
    xpad_ref[0:C, MARGIN:MARGIN + HW] = fea_ref[0].astype(xpad_ref.dtype)
    xpad_ref[C:CIN, MARGIN:MARGIN + HW] = sem_ref[0].astype(xpad_ref.dtype)

    # Column-validity masks: the flat zero margin handles the top/bottom halo, but a
    # horizontal shift crossing a row boundary would read the neighbouring row's pixel,
    # so left/right taps mask out the first/last image column.
    col = jax.lax.broadcasted_iota(jnp.int32, (CIN_PAD, HW), 1) % W
    mask_left = col >= 1          # taps with dx == 0
    mask_right = col <= W - 2     # taps with dx == 2

    # ---- im2col: 9 lane-shifted taps -> patches [9*CIN_PAD, HW] ----
    for dy in range(3):
        for dx in range(3):
            t = dy * 3 + dx
            start = MARGIN + (dy - 1) * W + (dx - 1)
            tap = xpad_ref[:, start:start + HW]          # [CIN_PAD, HW]
            if dx == 0:
                tap = jnp.where(mask_left, tap, 0.0)
            elif dx == 2:
                tap = jnp.where(mask_right, tap, 0.0)
            patches_ref[t * CIN_PAD:(t + 1) * CIN_PAD, :] = tap

    # ---- one MXU matmul + bias + ReLU, single lane-dense store ----
    # (On v6e/v7x, casting w_ref / patches to bf16 here halves MXU input width; kept f32
    #  so the self-test matches the f32 reference tightly.)
    acc = jnp.dot(w_ref[...], patches_ref[...], preferred_element_type=jnp.float32)
    o_ref[0] = jnp.maximum(acc + b_ref[...], 0.0).astype(o_ref.dtype)


def enhance_network_forward(fea, sem, w, b):
    """EnhanceNetwork.forward == fusion(fea, sem): ReLU(conv3x3(cat([fea, sem], C)))."""
    N, C, H, W = fea.shape
    HW = H * W
    CIN = C + 3
    COUT = w.shape[0]
    CIN_PAD = -(-CIN // 8) * 8        # pad channel dims to sublane multiples
    COUT_PAD = -(-COUT // 8) * 8
    K = 9 * CIN_PAD

    # Spatial flatten is free (trailing contiguous dims); concat/pad happen in-kernel.
    fea_flat = fea.reshape(N, C, HW)
    sem_flat = sem.reshape(N, 3, HW)

    # Weights OIHW -> [COUT_PAD, 9*CIN_PAD]; row order (dy, dx, ci) matches the im2col rows.
    wt = jnp.transpose(w, (0, 2, 3, 1))                                   # [O, kh, kw, I]
    wt = jnp.pad(wt, ((0, COUT_PAD - COUT), (0, 0), (0, 0), (0, CIN_PAD - CIN)))
    w_mat = wt.reshape(COUT_PAD, K).astype(jnp.float32)
    b_col = jnp.pad(b, (0, COUT_PAD - COUT)).astype(jnp.float32).reshape(COUT_PAD, 1)

    kernel = functools.partial(_fusion_conv_kernel, C=C, H=H, W=W)
    flops = 2 * N * COUT * CIN * 9 * HW
    bytes_accessed = 4 * (N * CIN * HW + COUT_PAD * K + COUT_PAD + N * COUT_PAD * HW)

    out = pl.pallas_call(
        kernel,
        out_shape=jax.ShapeDtypeStruct((N, COUT_PAD, HW), fea.dtype),
        grid=(N,),                      # 2 parallel steps -> both v7x TensorCores busy
        in_specs=[
            pl.BlockSpec((1, C, HW), lambda n: (n, 0, 0)),
            pl.BlockSpec((1, 3, HW), lambda n: (n, 0, 0)),
            pl.BlockSpec((COUT_PAD, K), lambda n: (0, 0)),     # weights resident in VMEM
            pl.BlockSpec((COUT_PAD, 1), lambda n: (0, 0)),     # bias in VMEM
        ],
        out_specs=pl.BlockSpec((1, COUT_PAD, HW), lambda n: (n, 0, 0)),
        scratch_shapes=[
            pltpu.VMEM((CIN_PAD, HW + 2 * (W + 1)), jnp.float32),  # padded activations
            pltpu.VMEM((K, HW), jnp.float32),                      # im2col patches
        ],
        compiler_params=pltpu.CompilerParams(dimension_semantics=("parallel",)),
        cost_estimate=pl.CostEstimate(flops=flops, transcendentals=0,
                                      bytes_accessed=bytes_accessed),
    )(fea_flat, sem_flat, w_mat, b_col)

    # NOTE: for large H (full-resolution inputs), tile H into row-bands with a +1-row
    # halo via the index_map to stay inside v7x's 64 MiB VMEM; whole-image blocks are
    # fine at this size.
    return out[:, :COUT, :].reshape(N, COUT, H, W)


if __name__ == "__main__":
    key = jax.random.PRNGKey(0)
    layers, channels = 3, 4      # `layers` only affects unused blocks in __init__
    N, H, W = 2, 16, 16
    Cin = channels + 3           # fusion conv sees channels + 3 input channels

    k1, k2, k3, k4 = jax.random.split(key, 4)
    fea = jax.random.normal(k1, (N, channels, H, W), jnp.float32)
    sem = jax.random.normal(k2, (N, 3, H, W), jnp.float32)

    # Deterministic init mirroring PyTorch Conv2d default (uniform ±1/sqrt(fan_in)).
    fan_in = Cin * 3 * 3
    bound = float(1.0 / (fan_in ** 0.5))
    w = jax.random.uniform(k3, (channels, Cin, 3, 3), jnp.float32, -bound, bound)
    b = jax.random.uniform(k4, (channels,), jnp.float32, -bound, bound)

    out = enhance_network_forward(fea, sem, w, b)
    out = jax.block_until_ready(out)

    # Plain-JAX reference for correctness sanity check.
    x_cat = jnp.concatenate([fea, sem], axis=1)
    ref = jax.lax.conv_general_dilated(
        x_cat, w, window_strides=(1, 1), padding="SAME",
        dimension_numbers=("NCHW", "OIHW", "NCHW"),
        precision=jax.lax.Precision.HIGHEST)
    ref = jnp.maximum(ref + b[None, :, None, None], 0.0)

    assert out.shape == (N, channels, H, W)
    assert jnp.allclose(out, ref, atol=1e-4, rtol=1e-4), "Pallas conv mismatch vs reference"
    print("KERNEL_OK")
</pallas_src>

<mosaic_0001>
module attributes {stable_mosaic.version = 11 : i64} {
  func.func @_fusion_conv_kernel(%arg0: i32, %arg1: memref<1x4x256xf32, #tpu.memory_space<vmem>>, %arg2: memref<1x3x256xf32, #tpu.memory_space<vmem>>, %arg3: memref<8x72xf32, #tpu.memory_space<vmem>>, %arg4: memref<8x1xf32, #tpu.memory_space<vmem>>, %arg5: memref<1x8x256xf32, #tpu.memory_space<vmem>>, %arg6: memref<8x290xf32, #tpu.memory_space<vmem>>, %arg7: memref<72x256xf32, #tpu.memory_space<vmem>>) attributes {dimension_semantics = [#tpu.dimension_semantics<parallel>], iteration_bounds = array<i64: 2>, scalar_prefetch = 0 : i64, scratch_operands = 2 : i64, tpu.core_type = #tpu.core_type<tc>, window_params = [{transform_indices = @transform_0, window_bounds = array<i64: 1, 4, 256>}, {transform_indices = @transform_1, window_bounds = array<i64: 1, 3, 256>}, {pipeline_mode = #tpu.pipeline_mode<synchronous>, transform_indices = @transform_2, window_bounds = array<i64: 8, 72>}, {pipeline_mode = #tpu.pipeline_mode<synchronous>, transform_indices = @transform_3, window_bounds = array<i64: 8, 1>}, {transform_indices = @transform_4, window_bounds = array<i64: 1, 8, 256>}]} {
    %cst = arith.constant 0.000000e+00 : f32
    %0 = vector.broadcast %cst : f32 to vector<8x290xf32>
    %c0 = arith.constant 0 : index
    %c0_0 = arith.constant 0 : index
    %1 = vector.load %arg6[%c0, %c0_0] : memref<8x290xf32, #tpu.memory_space<vmem>>, vector<8x290xf32>
    tpu.vector_store %arg6[%c0, %c0_0], %0 {strides = array<i32>} : memref<8x290xf32, #tpu.memory_space<vmem>>, vector<8x290xf32>,
    %c0_1 = arith.constant 0 : index
    %c0_2 = arith.constant 0 : index
    %c0_3 = arith.constant 0 : index
    %2 = vector.load %arg1[%c0_1, %c0_2, %c0_3] : memref<1x4x256xf32, #tpu.memory_space<vmem>>, vector<1x4x256xf32>
    %3 = vector.shape_cast %2 : vector<1x4x256xf32> to vector<4x256xf32>
    %c0_4 = arith.constant 0 : index
    %c17 = arith.constant 17 : index
    %4 = vector.load %arg6[%c0_4, %c17] : memref<8x290xf32, #tpu.memory_space<vmem>>, vector<4x256xf32>
    tpu.vector_store %arg6[%c0_4, %c17], %3 {strides = array<i32>} : memref<8x290xf32, #tpu.memory_space<vmem>>, vector<4x256xf32>,
    %c0_5 = arith.constant 0 : index
    %c0_6 = arith.constant 0 : index
    %c0_7 = arith.constant 0 : index
    %5 = vector.load %arg2[%c0_5, %c0_6, %c0_7] : memref<1x3x256xf32, #tpu.memory_space<vmem>>, vector<1x3x256xf32>
    %6 = vector.shape_cast %5 : vector<1x3x256xf32> to vector<3x256xf32>
    %c4 = arith.constant 4 : index
    %c17_8 = arith.constant 17 : index
    %7 = vector.load %arg6[%c4, %c17_8] : memref<8x290xf32, #tpu.memory_space<vmem>>, vector<3x256xf32>
    tpu.vector_store %arg6[%c4, %c17_8], %6 {strides = array<i32>} : memref<8x290xf32, #tpu.memory_space<vmem>>, vector<3x256xf32>,
    %8 = tpu.iota {dimensions = array<i32: 1>} : vector<8x256xi32>
    %c16_i32 = arith.constant 16 : i32
    %c0_i32 = arith.constant 0 : i32
    %9 = arith.cmpi eq, %c16_i32, %c0_i32 : i32
    %c1_i32 = arith.constant 1 : i32
    %10 = arith.select %9, %c1_i32, %c16_i32 : i32
    %11 = vector.broadcast %10 : i32 to vector<8x256xi32>
    %12 = arith.remsi %8, %11 : vector<8x256xi32>
    %c0_i32_9 = arith.constant 0 : i32
    %13 = vector.broadcast %c0_i32_9 : i32 to vector<8x256xi32>
    %14 = arith.cmpi ne, %12, %13 : vector<8x256xi32>
    %c0_i32_10 = arith.constant 0 : i32
    %15 = vector.broadcast %c0_i32_10 : i32 to vector<8x256xi32>
    %16 = arith.cmpi slt, %12, %15 : vector<8x256xi32>
    %c0_i32_11 = arith.constant 0 : i32
    %17 = arith.cmpi slt, %10, %c0_i32_11 : i32
    %18 = vector.broadcast %17 : i1 to vector<8x256xi1>
    %19 = vector.broadcast %18 : vector<8x256xi1> to vector<8x256xi1>
    %20 = arith.xori %16, %19 : vector<8x256xi1>
    %21 = arith.andi %20, %14 : vector<8x256xi1>
    %22 = vector.broadcast %10 : i32 to vector<8x256xi32>
    %23 = arith.addi %12, %22 : vector<8x256xi32>
    %24 = arith.select %21, %23, %12 : vector<8x256xi1>, vector<8x256xi32>
    %c1_i32_12 = arith.constant 1 : i32
    %25 = vector.broadcast %c1_i32_12 : i32 to vector<8x256xi32>
    %26 = arith.cmpi sge, %24, %25 : vector<8x256xi32>
    %c14_i32 = arith.constant 14 : i32
    %27 = vector.broadcast %c14_i32 : i32 to vector<8x256xi32>
    %28 = arith.cmpi sle, %24, %27 : vector<8x256xi32>
    %c0_13 = arith.constant 0 : index
    %c0_14 = arith.constant 0 : index
    %29 = vector.load %arg6[%c0_13, %c0_14] : memref<8x290xf32, #tpu.memory_space<vmem>>, vector<8x256xf32>
    %cst_15 = arith.constant 0.000000e+00 : f32
    %30 = vector.broadcast %cst_15 : f32 to vector<8x256xf32>
    %31 = arith.select %26, %29, %30 : vector<8x256xi1>, vector<8x256xf32>
    %c0_16 = arith.constant 0 : index
    %c0_17 = arith.constant 0 : index
    %32 = vector.load %arg7[%c0_16, %c0_17] : memref<72x256xf32, #tpu.memory_space<vmem>>, vector<8x256xf32>
    tpu.vector_store %arg7[%c0_16, %c0_17], %31 {strides = array<i32>} : memref<72x256xf32, #tpu.memory_space<vmem>>, vector<8x256xf32>,
    %c0_18 = arith.constant 0 : index
    %c1 = arith.constant 1 : index
    %33 = vector.load %arg6[%c0_18, %c1] : memref<8x290xf32, #tpu.memory_space<vmem>>, vector<8x256xf32>
    %c8 = arith.constant 8 : index
    %c0_19 = arith.constant 0 : index
    %34 = vector.load %arg7[%c8, %c0_19] : memref<72x256xf32, #tpu.memory_space<vmem>>, vector<8x256xf32>
    tpu.vector_store %arg7[%c8, %c0_19], %33 {strides = array<i32>} : memref<72x256xf32, #tpu.memory_space<vmem>>, vector<8x256xf32>,
    %c0_20 = arith.constant 0 : index
    %c2 = arith.constant 2 : index
    %35 = vector.load %arg6[%c0_20, %c2] : memref<8x290xf32, #tpu.memory_space<vmem>>, vector<8x256xf32>
    %cst_21 = arith.constant 0.000000e+00 : f32
    %36 = vector.broadcast %cst_21 : f32 to vector<8x256xf32>
    %37 = arith.select %28, %35, %36 : vector<8x256xi1>, vector<8x256xf32>
    %c16 = arith.constant 16 : index
    %c0_22 = arith.constant 0 : index
    %38 = vector.load %arg7[%c16, %c0_22] : memref<72x256xf32, #tpu.memory_space<vmem>>, vector<8x256xf32>
    tpu.vector_store %arg7[%c16, %c0_22], %37 {strides = array<i32>} : memref<72x256xf32, #tpu.memory_space<vmem>>, vector<8x256xf32>,
    %c0_23 = arith.constant 0 : index
    %c16_24 = arith.constant 16 : index
    %39 = vector.load %arg6[%c0_23, %c16_24] : memref<8x290xf32, #tpu.memory_space<vmem>>, vector<8x256xf32>
    %cst_25 = arith.constant 0.000000e+00 : f32
    %40 = vector.broadcast %cst_25 : f32 to vector<8x256xf32>
    %41 = arith.select %26, %39, %40 : vector<8x256xi1>, vector<8x256xf32>
    %c24 = arith.constant 24 : index
    %c0_26 = arith.constant 0 : index
    %42 = vector.load %arg7[%c24, %c0_26] : memref<72x256xf32, #tpu.memory_space<vmem>>, vector<8x256xf32>
    tpu.vector_store %arg7[%c24, %c0_26], %41 {strides = array<i32>} : memref<72x256xf32, #tpu.memory_space<vmem>>, vector<8x256xf32>,
    %c0_27 = arith.constant 0 : index
    %c17_28 = arith.constant 17 : index
    %43 = vector.load %arg6[%c0_27, %c17_28] : memref<8x290xf32, #tpu.memory_space<vmem>>, vector<8x256xf32>
    %c32 = arith.constant 32 : index
    %c0_29 = arith.constant 0 : index
    %44 = vector.load %arg7[%c32, %c0_29] : memref<72x256xf32, #tpu.memory_space<vmem>>, vector<8x256xf32>
    tpu.vector_store %arg7[%c32, %c0_29], %43 {strides = array<i32>} : memref<72x256xf32, #tpu.memory_space<vmem>>, vector<8x256xf32>,
    %c0_30 = arith.constant 0 : index
    %c18 = arith.constant 18 : index
    %45 = vector.load %arg6[%c0_30, %c18] : memref<8x290xf32, #tpu.memory_space<vmem>>, vector<8x256xf32>
    %cst_31 = arith.constant 0.000000e+00 : f32
    %46 = vector.broadcast %cst_31 : f32 to vector<8x256xf32>
    %47 = arith.select %28, %45, %46 : vector<8x256xi1>, vector<8x256xf32>
    %c40 = arith.constant 40 : index
    %c0_32 = arith.constant 0 : index
    %48 = vector.load %arg7[%c40, %c0_32] : memref<72x256xf32, #tpu.memory_space<vmem>>, vector<8x256xf32>
    tpu.vector_store %arg7[%c40, %c0_32], %47 {strides = array<i32>} : memref<72x256xf32, #tpu.memory_space<vmem>>, vector<8x256xf32>,
    %c0_33 = arith.constant 0 : index
    %c32_34 = arith.constant 32 : index
    %49 = vector.load %arg6[%c0_33, %c32_34] : memref<8x290xf32, #tpu.memory_space<vmem>>, vector<8x256xf32>
    %cst_35 = arith.constant 0.000000e+00 : f32
    %50 = vector.broadcast %cst_35 : f32 to vector<8x256xf32>
    %51 = arith.select %26, %49, %50 : vector<8x256xi1>, vector<8x256xf32>
    %c48 = arith.constant 48 : index
    %c0_36 = arith.constant 0 : index
    %52 = vector.load %arg7[%c48, %c0_36] : memref<72x256xf32, #tpu.memory_space<vmem>>, vector<8x256xf32>
    tpu.vector_store %arg7[%c48, %c0_36], %51 {strides = array<i32>} : memref<72x256xf32, #tpu.memory_space<vmem>>, vector<8x256xf32>,
    %c0_37 = arith.constant 0 : index
    %c33 = arith.constant 33 : index
    %53 = vector.load %arg6[%c0_37, %c33] : memref<8x290xf32, #tpu.memory_space<vmem>>, vector<8x256xf32>
    %c56 = arith.constant 56 : index
    %c0_38 = arith.constant 0 : index
    %54 = vector.load %arg7[%c56, %c0_38] : memref<72x256xf32, #tpu.memory_space<vmem>>, vector<8x256xf32>
    tpu.vector_store %arg7[%c56, %c0_38], %53 {strides = array<i32>} : memref<72x256xf32, #tpu.memory_space<vmem>>, vector<8x256xf32>,
    %c0_39 = arith.constant 0 : index
    %c34 = arith.constant 34 : index
    %55 = vector.load %arg6[%c0_39, %c34] : memref<8x290xf32, #tpu.memory_space<vmem>>, vector<8x256xf32>
    %cst_40 = arith.constant 0.000000e+00 : f32
    %56 = vector.broadcast %cst_40 : f32 to vector<8x256xf32>
    %57 = arith.select %28, %55, %56 : vector<8x256xi1>, vector<8x256xf32>
    %c64 = arith.constant 64 : index
    %c0_41 = arith.constant 0 : index
    %58 = vector.load %arg7[%c64, %c0_41] : memref<72x256xf32, #tpu.memory_space<vmem>>, vector<8x256xf32>
    tpu.vector_store %arg7[%c64, %c0_41], %57 {strides = array<i32>} : memref<72x256xf32, #tpu.memory_space<vmem>>, vector<8x256xf32>,
    %c0_42 = arith.constant 0 : index
    %c0_43 = arith.constant 0 : index
    %59 = vector.load %arg3[%c0_42, %c0_43] : memref<8x72xf32, #tpu.memory_space<vmem>>, vector<8x72xf32>
    %c0_44 = arith.constant 0 : index
    %c0_45 = arith.constant 0 : index
    %60 = vector.load %arg7[%c0_44, %c0_45] : memref<72x256xf32, #tpu.memory_space<vmem>>, vector<72x256xf32>
    %cst_46 = arith.constant dense<0.000000e+00> : vector<8x256xf32>
    %61 = tpu.matmul %59, %60, %cst_46 {dimension_numbers = #tpu.dot_dimension_numbers<[1], [0], [0], [1], [0, 0, 1, 1], [], []>} : vector<8x72xf32>, vector<72x256xf32>, vector<8x256xf32> -> vector<8x256xf32>
    %c0_47 = arith.constant 0 : index
    %c0_48 = arith.constant 0 : index
    %62 = vector.load %arg4[%c0_47, %c0_48] : memref<8x1xf32, #tpu.memory_space<vmem>>, vector<8x1xf32>
    %63 = vector.broadcast %62 : vector<8x1xf32> to vector<8x256xf32>
    %64 = arith.addf %61, %63 : vector<8x256xf32>
    %cst_49 = arith.constant 0.000000e+00 : f32
    %65 = vector.broadcast %cst_49 : f32 to vector<8x256xf32>
    %66 = arith.maximumf %64, %65 : vector<8x256xf32>
    %c0_50 = arith.constant 0 : index
    %c0_51 = arith.constant 0 : index
    %c0_52 = arith.constant 0 : index
    %67 = vector.load %arg5[%c0_50, %c0_51, %c0_52] : memref<1x8x256xf32, #tpu.memory_space<vmem>>, vector<1x8x256xf32>
    %68 = vector.shape_cast %67 : vector<1x8x256xf32> to vector<8x256xf32>
    %69 = vector.shape_cast %66 : vector<8x256xf32> to vector<1x8x256xf32>
    tpu.vector_store %arg5[%c0_50, %c0_51, %c0_52], %69 {strides = array<i32>} : memref<1x8x256xf32, #tpu.memory_space<vmem>>, vector<1x8x256xf32>,
    return
  }
  func.func @transform_0(%arg0: i32) -> (i32, i32, i32) {
    %c0_i32 = arith.constant 0 : i32
    %c0_i32_0 = arith.constant 0 : i32
    %c0_i32_1 = arith.constant 0 : i32
    return %arg0, %c0_i32, %c0_i32_0 : i32, i32, i32
  }
  func.func @transform_1(%arg0: i32) -> (i32, i32, i32) {
    %c0_i32 = arith.constant 0 : i32
    %c0_i32_0 = arith.constant 0 : i32
    %c0_i32_1 = arith.constant 0 : i32
    return %arg0, %c0_i32, %c0_i32_0 : i32, i32, i32
  }
  func.func @transform_2(%arg0: i32) -> (i32, i32) {
    %c0_i32 = arith.constant 0 : i32
    %c0_i32_0 = arith.constant 0 : i32
    %c0_i32_1 = arith.constant 0 : i32
    return %c0_i32, %c0_i32_0 : i32, i32
  }
  func.func @transform_3(%arg0: i32) -> (i32, i32) {
    %c0_i32 = arith.constant 0 : i32
    %c0_i32_0 = arith.constant 0 : i32
    %c0_i32_1 = arith.constant 0 : i32
    return %c0_i32, %c0_i32_0 : i32, i32
  }
  func.func @transform_4(%arg0: i32) -> (i32, i32, i32) {
    %c0_i32 = arith.constant 0 : i32
    %c0_i32_0 = arith.constant 0 : i32
    %c0_i32_1 = arith.constant 0 : i32
    return %arg0, %c0_i32, %c0_i32_0 : i32, i32, i32
  }
}

</mosaic_0001>

<bundles_post_ra>
// kernel: tpu_custom_call.1
= control target key start
LH: loop header
LB: loop body
LE: loop exit
PB: predicated region body
PF: predicated region fallthrough
CT: control target
= control target key end

     0   :  { %9 = vsyncpa [#allocation5], 0  ;;  %s968_s0 = inlined_call_operand.vmem [shape: f32[2,4,256], index: 0, kind: input, shape index: {}]   ;;  %s969_s1 = inlined_call_operand.vmem [shape: f32[2,3,256], index: 1, kind: input, shape index: {}]   ;;  %s970_s2 = inlined_call_operand.vmem [shape: f32[8,72], index: 2, kind: input, shape index: {}]   ;;  %s971_s3 = inlined_call_operand.vmem [shape: f32[8,1], index: 3, kind: input, shape index: {}]   ;;  %s972_s4 = inlined_call_operand.hbm [shape: f32[2,8,256], index: 4, kind: output, shape index: {}]  }
   0x1   :  { %11 = vsyncpa [#allocation5 + $0x1], 0  ;;  %s816_s15 = smov 0   ;;  %s818_s16 = smov 0  }
   0x2   :  { %s820_s17 = smov 0   ;;  %s822_s18 = smov 0  }
   0x3 LB: > { %s837_s19 = sadd.s32 4294967295, %s778_s18   ;;  %s618_s20 = sadd.s32 4294967294, %s778_s18   ;;  %s778_s18 = sphi %s822_s18, %s986_s18   ;;  %s774_s17 = sphi %s820_s17, %s985_s17   ;;  %s770_s16 = sphi %s818_s16, %s984_s16   ;;  %s766_s15 = sphi %s816_s15, %s983_s15  }
   0x4   : > { %s841_s21 = sadd.s32 1, %s778_s18   ;;  %s118_s22 = sadd.s32 1, %s774_s17 }
   0x5   : > { %s115_s23 = ssub.s32 %s778_s18, %s841_s21  ;;  %p128_p0 = scmp.ne.s32.totalorder %s774_s17, %s770_s16 }
   0x6   : > { %p116_p1 = scmp.eq.s32.totalorder %s115_s23, 0  ;;  %p129_p2 = scmp.eq.s32.totalorder %s837_s19, 1 }
   0x7   : > { %p134_p3 = scmp.ne.s32.totalorder %s770_s16, %s766_s15  ;;  %p135_p4 = scmp.eq.s32.totalorder %s618_s20, 1 }
   0x8   : > { %s852_s24 = scalar_select %p116_p1, %s774_s17, %s118_s22  }
   0x9   : > { %p854_p5 = por %p129_p2, %p128_p0  ;;  %p858_p6 = por %p135_p4, %p134_p3 }
   0xa   : > { %p621_p7 = scmp.ge.s32.totalorder %s778_s18, 1  ;;  %p175_p8 = scmp.lt.s32.totalorder %s778_s18, 3 }
   0xc   : > { %p176_p9 = pnand %p621_p7, %p175_p8 }
   0xd   : > { %p206_p10 = scmp.lt.s32.totalorder (!%p176_p9), %s837_s19, 1  ;;  %s781_s9 = smov (!%p176_p9), 17  }
   0xe   : > { %179 = sbr.rel (%p176_p9) target bundleno = 471 (0x1d7), region = 36  ;;  %s782_s10 = smov (!%p176_p9), 94  }
   0xf   : > { %s783_s11 = smov (!%p176_p9), 111   ;;  %s784_s12 = smov (!%p176_p9), 95  }
  0x10   : > { %s785_s13 = smov (!%p176_p9), 96   ;;  %s786_s14 = smov (!%p176_p9), 112  }
  0x11   : > { %s787_s20 = smov (!%p176_p9), 110   ;;  %s788_s22 = smov (!%p176_p9), 126  }
  0x12   : > { %s789_s23 = smov (!%p176_p9), 127   ;;  %s636_s7 = sshll.u32 (!%p176_p9), %s837_s19, 4 }
  0x13   : > { %v780_v0 = vmov 0.0   ;;  %s207_s27 = scalar_select %p206_p10, %s837_s19, 1  ;;  %vm218_vm0 = vcmask 277504   ;;  %vm234_vm1 = vcmask 1043592   ;;  %vm229_vm2 = vcmask 138240   ;;  %v476_v42 = vld [vmem:[%s971_s3] sm:$0xff] }
  0x14   : > { %216 = vst [vmem:[#allocation2] sm:$0xff] %v780_v0  ;;  %vm237_vm3 = vcmask 134144   ;;  %vm253_vm4 = vcmask 1046668   ;;  %vm256_vm5 = vcmask 137220   ;;  %v258_v20 = vlaneseq }
  0x15   : > { %217 = vst [vmem:[#allocation2 + $0x8] sm:$0xff] %v780_v0  ;;  %s634_s28 = sshll.u32 %s207_s27, 3  ;;  %vm448_vm6 = vcmask 769024   ;;  %vm429_vm9 = vcmask 777216   ;;  %vm408_vm10 = vcmask 785408   ;;  %v790_v43 = vmov 0  }
  0x16   : > { %s210_s5 = scalar_lea.vmem %s968_s0, %s634_s28  ;;  %s215_s8 = scalar_lea.vmem %s969_s1, %s634_s28  ;;  %219 = vst.msk [vmem:[#allocation2 + $0x10] sm:$0xff] %vm218_vm0, %v780_v0  ;;  %v259_v22 = vand.u32 127, %v258_v20  ;;  %714 = vset.pattern.permute.xlu1 %v790_v43  ;;  %715 = vset.pattern.permute.xlu0 %v790_v43  ;;  %vm387_vm13 = vcmask 900096   ;;  %vm368_vm14 = vcmask 908288   ;;  %vm347_vm15 = vcmask 916480  }
  0x17   : > { %v220_v1 = vld [vmem:[%s210_s5] sm:$0xff]  ;;  %vm326_vm0 = vcmask 1031168   ;;  %s203_s5 = sand.u32 1, %s770_s16   ;;  %s736_s27 = scalar_lea.hbm %s972_s4, 32 }
  0x18   : > { %222 = vst [vmem:[#allocation1] ss:$2 sm:$0xff] %v220_v1  ;;  %v239_v2 = vld [vmem:[%s215_s8] sm:$0x77]  ;;  %v260_v25 = vadd.s32 128, %v259_v22  ;;  %v265_v27 = vand.u32 15, %v259_v22 }
  0x19   : > { %s622_s6 = sshll.u32 %s203_s5, 4 }
  0x1a   : > { %v272_v28 = vand.u32 15, %v260_v25  ;;  %vm888_vm7 = vcmp.le.s32.totalorder %v265_v27, 14  ;;  %vm903_vm11 = vcmp.ge.s32.totalorder %v265_v27, 1 }
  0x1c   : > { %vm892_vm8 = vcmp.le.s32.totalorder %v272_v28, 14  ;;  %vm907_vm12 = vcmp.ge.s32.totalorder %v272_v28, 1 }
  0x1f   : > { %v223_v3 = vld.sshfl [vmem:[#allocation1] sm:$0xff pattern:$0x75316420]  ;;  %v224_v4 = vld.sshfl [vmem:[#allocation1 + $0x8] sm:$0xff pattern:$0x75316420] }
  0x20   : > { %225 = vrot.lane.b32.xlu0 %v223_v3, %s781_s9  ;;  %242 = vst [vmem:[#allocation1 + $0x1] ss:$2 sm:$0xff] %v239_v2 }
  0x27   : > { %v243_v5 = vld.sshfl [vmem:[#allocation1] sm:$0xff pattern:$0x75316420]  ;;  %v244_v6 = vld.sshfl [vmem:[#allocation1 + $0x8] sm:$0xff pattern:$0x75316420] }
  0x28   : > { %227 = vrot.lane.b32.xlu0 %v224_v4, %s781_s9  ;;  %245 = vrot.lane.b32.xlu1 %v243_v5, %s781_s9  ;;  %v457_v5 = vld [vmem:[%s970_s2] sm:$0xff] }
  0x30   : > { %247 = vrot.lane.b32.xlu1 %v244_v6, %s781_s9 }
  0x92   : > { %v226_v7 = vpop.permute.xlu0 %225 }
  0x93   : > { %235 = vst.msk [vmem:[#allocation2] sm:$0xf] %vm234_vm1, %v226_v7  ;;  %vm307_vm1 = vcmask 1039360  }
  0x9a   : > { %v228_v8 = vpop.permute.xlu0 %227  ;;  %v246_v9 = vpop.permute.xlu1 %245 }
  0x9b   : > { %v230_v10 = vsel %vm229_vm2, %v226_v7, %v228_v8  ;;  %238 = vst.msk [vmem:[#allocation2 + $0x10] sm:$0xf] %vm237_vm3, %v228_v8 }
  0x9c   : > { %236 = vst [vmem:[#allocation2 + $0x8] sm:$0xf] %v230_v10 }
  0x9d   : > { %254 = vst.msk [vmem:[#allocation2] sm:$0x70] %vm253_vm4, %v246_v9 }
  0xa2   : > { %v248_v11 = vpop.permute.xlu1 %247 }
  0xa3   : > { %v249_v12 = vsel %vm229_vm2, %v246_v9, %v248_v11  ;;  %257 = vst.msk [vmem:[#allocation2 + $0x10] sm:$0x70] %vm256_vm5, %v248_v11  ;;  %vm482_vm2 = vcmask 588800  }
  0xa4   : > { %255 = vst [vmem:[#allocation2 + $0x8] sm:$0x70] %v249_v12  ;;  %v872_v13 = vld [vmem:[#allocation2] sm:$0xff] }
  0xa5   : > { %442 = vrot.lane.b32.xlu2 %v872_v13, %s782_s10 }
  0xaa   : > { %v438_v14 = vld [vmem:[#allocation2 + $0x10] sm:$0xff] }
  0xab   : > { %446 = vrot.lane.b32.xlu0 %v438_v14, %s782_s10  ;;  %366 = vrot.lane.b32.xlu1 %v438_v14, %s783_s11  ;;  %v876_v15 = vld [vmem:[#allocation2 + $0x8] sm:$0xff] }
  0xac   : > { %v699_v16 = vpack.i.bf16 %v876_v15, %v872_v13 }
  0xad   : > { %427 = vrot.lane.b32.xlu2 %v438_v14, %s784_s12 }
  0xb3   : > { %402 = vrot.lane.b32.xlu0 %v872_v13, %s785_s13  ;;  %345 = vrot.lane.b32.xlu1 %v438_v14, %s786_s14 }
  0xb5   : > { %406 = vrot.lane.b32.xlu2 %v438_v14, %s785_s13 }
  0xbb   : > { %381 = vrot.lane.b32.xlu0 %v872_v13, %s787_s20  ;;  %700 = vrot.lane.b32.xlu1 %v699_v16, %s784_s12 }
  0xbd   : > { %385 = vrot.lane.b32.xlu2 %v438_v14, %s787_s20 }
  0xc3   : > { %404 = vrot.lane.b32.xlu1 %v876_v15, %s785_s13  ;;  %705 = vrot.lane.b32.xlu0 %v699_v16, %s783_s11  ;;  %s205_s11 = scalar_lea.vmem [#allocation4], %s622_s6 }
  0xc4   : > { %s544_s12 = sshll.u32 %s205_s11, 4  ;;  %s545_s12 = int_to_ptr.vmem [resolvable:$true] %s544_s12 }
  0xc5   : > { %341 = vrot.lane.b32.xlu2 %v872_v13, %s786_s14 }
  0xcb   : > { %383 = vrot.lane.b32.xlu1 %v876_v15, %s787_s20  ;;  %343 = vrot.lane.b32.xlu0 %v876_v15, %s786_s14  ;;  %s531_s14 = scalar_lea.sflag [#allocation5], %s203_s5 }
  0xcd   : > { %444 = vrot.lane.b32.xlu2 %v876_v15, %s782_s10  ;;  %s542_s10 = scalar_lea.hbm %s972_s4, %s636_s7 }
  0xce   : > { %s546_s13 = sshll.u32 %s542_s10, 4  ;;  %s547_s13 = int_to_ptr.hbm [resolvable:$true] %s546_s13 }
  0xcf   : > { %s730_s20 = sshra.s32 %s547_s13, 4  ;;  %s731_s20 = int_to_ptr.hbm [resolvable:$true] %s730_s20 }
  0xd0   : > { %s732_s19 = scalar_lea.hbm %s731_s20, 16  ;;  %p737_p0 = scmp.lt.s32.totalorder %s731_s20, %s972_s4 }
  0xd1   : > { %p733_p11 = scmp.ne.s32.totalorder %s731_s20, %s732_s19  ;;  %p738_p1 = scmp.lt.s32.totalorder %s736_s27, %s732_s19 }
  0xd3   : > { %324 = vrot.lane.b32.xlu1 %v438_v14, %s788_s22  ;;  %322 = vrot.lane.b32.xlu0 %v876_v15, %s788_s22  ;;  %p734_p12 = pnand %p733_p11, %p854_p5  ;;  %p739_p2 = por %p738_p1, %p737_p0 }
  0xd5   : > { %320 = vrot.lane.b32.xlu2 %v872_v13, %s788_s22  ;;  %p735_p13 = pneg %p734_p12 }
  0xd7   : > { %p740_p3 = pnand %p739_p2, %p735_p13 }
  0xdb   : > { %305 = vrot.lane.b32.xlu0 %v438_v14, %s789_s23  ;;  %479 = vperm.xlu1 %714, %v476_v42  }
  0xdd   : > { %710 = vrot.lane.b32.xlu2 %v699_v16, %s789_s23 }
  0xff   : > { %v443_v17 = vpop.permute.xlu2 %442 }
 0x107   : > { %v428_v18 = vpop.permute.xlu2 %427 }
 0x10f   : > { %v407_v19 = vpop.permute.xlu2 %406 }
 0x117   : > { %v386_v21 = vpop.permute.xlu2 %385 }
 0x11d   : > { %v447_v23 = vpop.permute.xlu0 %446  ;;  %v367_v24 = vpop.permute.xlu1 %366 }
 0x11f   : > { %v342_v26 = vpop.permute.xlu2 %341 }
 0x125   : > { %v403_v29 = vpop.permute.xlu0 %402  ;;  %v346_v30 = vpop.permute.xlu1 %345 }
 0x127   : > { %v445_v33 = vpop.permute.xlu2 %444 }
 0x128   : > { %v449_v34 = vsel %vm448_vm6, %v443_v17, %v445_v33  ;;  %v450_v35 = vsel %vm448_vm6, %v445_v33, %v447_v23 }
 0x129   : > { %637 = vmatpush.msk.msra.mxu0 %vm888_vm7, %v449_v34  ;;  %643 = vmatpush.msk.msra.mxu1 %vm892_vm8, %v450_v35 }
 0x12d   : > { %v382_v36 = vpop.permute.xlu0 %381  ;;  %v701_v37 = vpop.permute.xlu1 %700 }
 0x12e   : > { %v703_v38 = vunpack.i.h.bf16 %v701_v37  ;;  %v702_v39 = vunpack.i.l.bf16 %v701_v37 }
 0x12f   : > { %v321_v50 = vpop.permute.xlu2 %320 }
 0x130   : > { %v430_v40 = vsel %vm429_vm9, %v702_v39, %v703_v38  ;;  %v431_v41 = vsel %vm429_vm9, %v703_v38, %v428_v18 }
 0x131   : > { %494 = vmatpush.msra.mxu0 %v430_v40  ;;  %514 = vmatpush.msra.mxu1 %v431_v41 }
 0x135   : > { %v405_v46 = vpop.permute.xlu1 %404  ;;  %v706_v47 = vpop.permute.xlu0 %705 }
 0x136   : > { %v409_v48 = vsel %vm408_vm10, %v403_v29, %v405_v46  ;;  %v410_v49 = vsel %vm408_vm10, %v405_v46, %v407_v19  ;;  %v708_v51 = vunpack.i.h.bf16 %v706_v47  ;;  %v707_v52 = vunpack.i.l.bf16 %v706_v47 }
 0x137   : > { %638 = vmatpush.msk.msra.mxu0 %vm903_vm11, %v409_v48  ;;  %644 = vmatpush.msk.msra.mxu1 %vm907_vm12, %v410_v49  ;;  %v711_v59 = vpop.permute.xlu2 %710 }
 0x138   : > { %v369_v57 = vsel %vm368_vm14, %v707_v52, %v708_v51  ;;  %v370_v58 = vsel %vm368_vm14, %v708_v51, %v367_v24  ;;  %v713_v62 = vunpack.i.h.bf16 %v711_v59  ;;  %v712_v63 = vunpack.i.l.bf16 %v711_v59 }
 0x13a   : > { %v308_v4 = vsel %vm307_vm1, %v712_v63, %v713_v62 }
 0x13d   : > { %v384_v53 = vpop.permute.xlu1 %383  ;;  %v344_v54 = vpop.permute.xlu0 %343 }
 0x13e   : > { %v388_v55 = vsel %vm387_vm13, %v382_v36, %v384_v53  ;;  %v389_v56 = vsel %vm387_vm13, %v384_v53, %v386_v21  ;;  %v348_v60 = vsel %vm347_vm15, %v342_v26, %v344_v54  ;;  %v349_v61 = vsel %vm347_vm15, %v344_v54, %v346_v30 }
 0x13f   : > { %639 = vmatpush.msk.msra.mxu0 %vm888_vm7, %v388_v55  ;;  %645 = vmatpush.msk.msra.mxu1 %vm892_vm8, %v389_v56 }
 0x141   : > { %497 = vmatpush.msra.mxu0 %v369_v57  ;;  %517 = vmatpush.msra.mxu1 %v370_v58 }
 0x143   : > { %640 = vmatpush.msk.msra.mxu0 %vm903_vm11, %v348_v60  ;;  %646 = vmatpush.msk.msra.mxu1 %vm907_vm12, %v349_v61 }
 0x145   : > { %v325_v0 = vpop.permute.xlu1 %324  ;;  %v323_v1 = vpop.permute.xlu0 %322 }
 0x146   : > { %v327_v2 = vsel %vm326_vm0, %v321_v50, %v323_v1  ;;  %v328_v3 = vsel %vm326_vm0, %v323_v1, %v325_v0 }
 0x147   : > { %641 = vmatpush.msk.msra.mxu0 %vm888_vm7, %v327_v2  ;;  %647 = vmatpush.msk.msra.mxu1 %vm892_vm8, %v328_v3 }
 0x149   : > { %500 = vmatpush.msra.mxu0 %v308_v4 }
 0x14b   : > { %642 = vmatpush.msk.msra.mxu0 %vm903_vm11, %v872_v13 }
 0x14c   : > { %627 = vmatmul.msk.f32.vlgmr.msra.gmra.mxu0 %vm482_vm2, %v457_v5 }
 0x14d   : > { %v306_v6 = vpop.permute.xlu0 %305  ;;  %v480_v8 = vpop.permute.xlu1 %479 }
 0x14e   : > { %v309_v7 = vsel %vm307_vm1, %v713_v62, %v306_v6 }
 0x14f   : > { %520 = vmatpush.msra.mxu1 %v309_v7 }
 0x151   : > { %648 = vmatpush.msk.msra.mxu1 %vm907_vm12, %v876_v15 }
 0x152   : > { %628 = vmatmul.msk.f32.vlgmr.msra.gmra.mxu1 %vm482_vm2, %v457_v5 }
 0x1c9   : > { %v503_v9 = vpop.f32.mrf.mxu0 }
 0x1ca   : > { %v504_v10 = vadd.f32 %v503_v9, %v480_v8 }
 0x1cc   : > { %v526_v11 = vmax.f32 %v504_v10, 0.0 }
 0x1ce   : > { %528 = vst [vmem:[%s205_s11] sm:$0xff] %v526_v11 }
 0x1cf   : > { %v523_v12 = vpop.f32.mrf.mxu1 }
 0x1d0   : > { %v524_v13 = vadd.f32 %v523_v12, %v480_v8 }
 0x1d2   : > { %v527_v14 = vmax.f32 %v524_v13, 0.0 }
 0x1d4   : > { %529 = vst [vmem:[%s205_s11 + $0x8] sm:$0xff] %v527_v14 }
 0x1d5   : > { %743 = shalt.err (!%p740_p3)
}
 0x1d6   : > { %649 = dma.vmem_to_hbm [thread:$0]  (%p854_p5), %s545_s12, 256, %s547_s13, %s531_s14  }
 0x1d7 PF: > { %p655_p4 = scmp.ge.s32.totalorder %s778_s18, 2  ;;  %s558_s30 = sand.u32 1, %s766_s15  }
 0x1d8   : > { %s559_s5 = scalar_lea.sflag [#allocation5], %s558_s30 }
 0x1d9   : > { %p652_p7 = pnand %p655_p4, %p858_p6 }
 0x1db   : > { %p653_p8 = pneg %p652_p7 }
 0x1dd   : > { %761 = dma.done.wait (%p653_p8), %s559_s5, 256  }
 0x1de   : > { %763 = vsyncadd (%p653_p8), %s559_s5, 4294967040  ;;  %p14_p9 = scmp.ge.s32.totalorder %s841_s21, 4   ;;  %s983_s15 = smov %s770_s16 }
 0x1df   : > { %s984_s16 = smov %s774_s17  ;;  %s985_s17 = smov %s852_s24 }
 0x1e0   : > { %s986_s18 = smov %s841_s21  ;;  %16 = sbr.rel (!%p14_p9) target bundleno = 3 (0x3), region = 75 }
 0x1e5   :  { %565 = vsyncpa [#allocation5], 1 }
 0x1e6   :  { %567 = vsyncpa [#allocation5 + $0x1], 1 }

</bundles_post_ra>
